<compile_context>
chip_gen: v7x
topology: tpu7x:2x2x1
jax: 0.10.0
libtpu: 0.0.40
codegen_flags: <defaults>
</compile_context>

<pallas_src>
import functools

import jax
import jax.numpy as jnp
from jax.experimental import pallas as pl
from jax.experimental.pallas import tpu as pltpu


def _silu(v):
    # sigmoid(v) = 0.5 * (1 + tanh(0.5 * v))  -> single EUP op per element
    return v * (0.5 * (1.0 + jnp.tanh(0.5 * v)))


def _basic_block2_kernel(x_ref, w1_ref, b1_ref, w2_ref, b2_ref, wr_ref, br_ref,
                         o_ref, *, use_mxu):
    # x_ref : (C1, TM)   channels-first activation tile (M on lanes)
    # w1_ref: (Cm, C1)   conv1 weight with BN scale folded in   (Cm = 2*C2)
    # b1_ref: (Cm, 1)    folded BN bias of conv1
    # w2_ref: (C2, Cm), b2_ref: (C2, 1)   conv2 (folded)
    # wr_ref: (C2, C1), br_ref: (C2, 1)   res   (folded)
    # o_ref : (C2, TM)
    x = x_ref[...].astype(jnp.float32)

    def mix(w_ref, b_ref, v):
        w = w_ref[...]
        if use_mxu:
            y = jnp.dot(w, v, preferred_element_type=jnp.float32,
                        precision=jax.lax.Precision.HIGHEST)
        else:
            # Tiny channel count: contraction of 4-16 wastes the MXU and forces
            # operand relayout; unrolled VPU broadcast-FMAs instead.
            cin = v.shape[0]
            y = w[:, 0:1] * v[0:1, :]
            for c in range(1, cin):
                y = y + w[:, c:c + 1] * v[c:c + 1, :]
        return y + b_ref[...]

    h = _silu(mix(w1_ref, b1_ref, x))   # conv1 + BN + SiLU
    u = _silu(mix(w2_ref, b2_ref, h))   # conv2 + BN + SiLU
    r = _silu(mix(wr_ref, br_ref, x))   # res   + BN + SiLU

    # x + conv2(conv1(x)) * res(x)
    o_ref[...] = (x + u * r).astype(o_ref.dtype)


def _round_up(x, m):
    return ((x + m - 1) // m) * m


_VMEM_TILE_BUDGET = 20 * 1024 * 1024   # activation-tile budget per grid step
_VMEM_LIMIT = 32 * 1024 * 1024         # fits v7x (64 MiB/TC) and v5e/v6e (128 MiB)


def _pick_tile(M, N, c1, cm, c2, in_bytes, out_bytes):
    """Lane-dense tile along flattened spatial axis, sized from a VMEM budget."""
    if M <= 128:
        return M
    # Double-buffered in/out blocks + f32 intermediates (x, h, u, r) per lane.
    per_lane = 2 * (c1 * in_bytes + c2 * out_bytes) + 4 * (c1 + cm + 2 * c2)
    tm = max(128, (_VMEM_TILE_BUDGET // per_lane) // 128 * 128)
    tm = min(tm, _round_up(M, 128))
    # Megacore: make sure there are >= 2 total grid steps (2 TCs on v7x).
    if N * ((M + tm - 1) // tm) < 2:
        tm = max(128, _round_up((M + 1) // 2, 128))
    return tm


def basic_block_2(x_ncdhw, w1, bn1, w2, bn2, wr, bnr, eps=1e-5):
    """x_ncdhw: (N, C1, D, H, W).  w*: PyTorch Conv3d weights (cout, cin, 1,1,1).
    bn*: tuples (gamma, beta, running_mean, running_var).  Returns NCDHW output."""
    N, C1, D, H, W = x_ncdhw.shape
    Cm = w1.shape[0]                # c_ = 2 * c2
    C2 = w2.shape[0]
    assert C1 == C2, "residual add in BasicBlock_2 requires c1 == c2"
    M = D * H * W

    def fold(w, bn):
        # Fold eval-mode BatchNorm3d into the (bias-free) 1x1x1 conv.
        # TODO(synk): training-mode (batch-statistics) BatchNorm is not computed
        # in-kernel; inference / running-stats semantics only.
        gamma, beta, mean, var = bn
        w2d = w.reshape(w.shape[0], w.shape[1]).astype(jnp.float32)  # (cout, cin)
        scale = gamma / jnp.sqrt(var + eps)
        wf = w2d * scale[:, None]
        bf = (beta - mean * scale).reshape(-1, 1).astype(jnp.float32)
        return wf, bf

    w1f, b1f = fold(w1, bn1)
    w2f, b2f = fold(w2, bn2)
    wrf, brf = fold(wr, bnr)

    # NCDHW is contiguous -> this reshape is free (no HBM data movement).
    x3 = x_ncdhw.reshape(N, C1, M)

    in_bytes = jnp.dtype(x_ncdhw.dtype).itemsize
    out_bytes = in_bytes
    TM = _pick_tile(M, N, C1, Cm, C2, in_bytes, out_bytes)
    num_m = pl.cdiv(M, TM)
    grid = (N, num_m)

    use_mxu = max(C1, Cm, C2) > 16
    kernel = functools.partial(_basic_block2_kernel, use_mxu=use_mxu)

    # Advisory cost estimate (memory-bound: ~ (C1+C2) * N * M * bytes of HBM).
    weight_bytes = 4 * (Cm * C1 + C2 * Cm + C2 * C1 + Cm + 2 * C2)
    cost = pl.CostEstimate(
        flops=int(N * M * (2 * (Cm * C1 + C2 * Cm + C2 * C1)
                           + 6 * (Cm + 2 * C2) + 3)),
        transcendentals=int(N * M * (Cm + 2 * C2)),
        bytes_accessed=int(N * M * (C1 * in_bytes + C2 * out_bytes)
                           + weight_bytes),
    )

    out = pl.pallas_call(
        kernel,
        out_shape=jax.ShapeDtypeStruct((N, C2, M), x_ncdhw.dtype),
        grid_spec=pltpu.PrefetchScalarGridSpec(
            num_scalar_prefetch=0,
            grid=grid,
            in_specs=[
                # activation tile: one (C1, TM) channels-first slab per (n, m)
                pl.BlockSpec((pl.Squeezed(), C1, TM), lambda n, m: (n, 0, m)),
                # small weights/biases: resident across the whole grid
                pl.BlockSpec((Cm, C1), lambda n, m: (0, 0)),
                pl.BlockSpec((Cm, 1), lambda n, m: (0, 0)),
                pl.BlockSpec((C2, Cm), lambda n, m: (0, 0)),
                pl.BlockSpec((C2, 1), lambda n, m: (0, 0)),
                pl.BlockSpec((C2, C1), lambda n, m: (0, 0)),
                pl.BlockSpec((C2, 1), lambda n, m: (0, 0)),
            ],
            out_specs=pl.BlockSpec((pl.Squeezed(), C2, TM),
                                   lambda n, m: (n, 0, m)),
        ),
        compiler_params=pltpu.CompilerParams(
            dimension_semantics=("parallel", "parallel"),
            vmem_limit_bytes=_VMEM_LIMIT,
        ),
        cost_estimate=cost,
    )(x3, w1f, b1f, w2f, b2f, wrf, brf)

    return out.reshape(N, C2, D, H, W)


def _reference(x, w1, bn1, w2, bn2, wr, bnr, eps=1e-5):
    """Pure-JAX reference with PyTorch (eval-mode) semantics."""
    def conv_bn_silu(v, w, bn):
        gamma, beta, mean, var = bn
        w2d = w.reshape(w.shape[0], w.shape[1])
        y = jnp.einsum("oi,nidhw->nodhw", w2d, v)
        scale = (gamma / jnp.sqrt(var + eps)).reshape(1, -1, 1, 1, 1)
        shift = (beta - mean * gamma / jnp.sqrt(var + eps)).reshape(1, -1, 1, 1, 1)
        y = y * scale + shift
        return y * jax.nn.sigmoid(y)

    h = conv_bn_silu(x, w1, bn1)
    u = conv_bn_silu(h, w2, bn2)
    r = conv_bn_silu(x, wr, bnr)
    return x + u * r


def _make_bn(k, c):
    kg, kb, km, kv = jax.random.split(k, 4)
    gamma = 1.0 + 0.1 * jax.random.normal(kg, (c,), jnp.float32)
    beta = 0.1 * jax.random.normal(kb, (c,), jnp.float32)
    mean = 0.1 * jax.random.normal(km, (c,), jnp.float32)
    var = jnp.abs(1.0 + 0.1 * jax.random.normal(kv, (c,), jnp.float32))
    return gamma, beta, mean, var


def _run_case(key, N, C1, C2, D, H, W, atol):
    Cm = 2 * C2
    keys = jax.random.split(key, 7)
    x = jax.random.normal(keys[0], (N, C1, D, H, W), dtype=jnp.float32)
    w1 = jax.random.normal(keys[1], (Cm, C1, 1, 1, 1), jnp.float32) * 0.3
    w2 = jax.random.normal(keys[2], (C2, Cm, 1, 1, 1), jnp.float32) * 0.3
    wr = jax.random.normal(keys[3], (C2, C1, 1, 1, 1), jnp.float32) * 0.3
    bn1 = _make_bn(keys[4], Cm)
    bn2 = _make_bn(keys[5], C2)
    bnr = _make_bn(keys[6], C2)

    out = basic_block_2(x, w1, bn1, w2, bn2, wr, bnr)
    out = jax.block_until_ready(out)
    ref = _reference(x, w1, bn1, w2, bn2, wr, bnr)
    assert out.shape == x.shape
    assert jnp.allclose(out, ref, atol=atol, rtol=atol), "mismatch vs reference"


if __name__ == "__main__":
    key = jax.random.PRNGKey(0)
    k1, k2 = jax.random.split(key, 2)

    # Case 1: module-consistent small shapes (tiny channels -> VPU FMA path).
    _run_case(k1, N=2, C1=4, C2=4, D=3, H=16, W=16, atol=1e-4)

    # Case 2: larger channels -> MXU dot path; N=1 exercises the megacore
    # grid-splitting of the spatial axis.
    _run_case(k2, N=1, C1=32, C2=32, D=4, H=8, W=8, atol=2e-3)

    print("KERNEL_OK")
</pallas_src>

<mosaic_0001>
module attributes {stable_mosaic.version = 11 : i64} {
  func.func @_basic_block2_kernel(%arg0: i32, %arg1: i32, %arg2: memref<1x4x768xf32, #tpu.memory_space<vmem>>, %arg3: memref<8x4xf32, #tpu.memory_space<vmem>>, %arg4: memref<8x1xf32, #tpu.memory_space<vmem>>, %arg5: memref<4x8xf32, #tpu.memory_space<vmem>>, %arg6: memref<4x1xf32, #tpu.memory_space<vmem>>, %arg7: memref<4x4xf32, #tpu.memory_space<vmem>>, %arg8: memref<4x1xf32, #tpu.memory_space<vmem>>, %arg9: memref<1x4x768xf32, #tpu.memory_space<vmem>>) attributes {dimension_semantics = [#tpu.dimension_semantics<parallel>, #tpu.dimension_semantics<parallel>], iteration_bounds = array<i64: 2, 1>, scalar_prefetch = 0 : i64, scratch_operands = 0 : i64, tpu.core_type = #tpu.core_type<tc>, window_params = [{transform_indices = @transform_0, window_bounds = array<i64: 1, 4, 768>}, {pipeline_mode = #tpu.pipeline_mode<synchronous>, transform_indices = @transform_1, window_bounds = array<i64: 8, 4>}, {pipeline_mode = #tpu.pipeline_mode<synchronous>, transform_indices = @transform_2, window_bounds = array<i64: 8, 1>}, {pipeline_mode = #tpu.pipeline_mode<synchronous>, transform_indices = @transform_3, window_bounds = array<i64: 4, 8>}, {pipeline_mode = #tpu.pipeline_mode<synchronous>, transform_indices = @transform_4, window_bounds = array<i64: 4, 1>}, {pipeline_mode = #tpu.pipeline_mode<synchronous>, transform_indices = @transform_5, window_bounds = array<i64: 4, 4>}, {pipeline_mode = #tpu.pipeline_mode<synchronous>, transform_indices = @transform_6, window_bounds = array<i64: 4, 1>}, {transform_indices = @transform_7, window_bounds = array<i64: 1, 4, 768>}]} {
    %c0 = arith.constant 0 : index
    %c0_0 = arith.constant 0 : index
    %c0_1 = arith.constant 0 : index
    %0 = vector.load %arg2[%c0, %c0_0, %c0_1] : memref<1x4x768xf32, #tpu.memory_space<vmem>>, vector<1x4x768xf32>
    %1 = vector.shape_cast %0 : vector<1x4x768xf32> to vector<4x768xf32>
    %c0_2 = arith.constant 0 : index
    %c0_3 = arith.constant 0 : index
    %2 = vector.load %arg3[%c0_2, %c0_3] : memref<8x4xf32, #tpu.memory_space<vmem>>, vector<8x4xf32>
    %3 = vector.extract_strided_slice %2 {offsets = [0, 0], sizes = [8, 1], strides = [1, 1]} : vector<8x4xf32> to vector<8x1xf32>
    %4 = vector.extract_strided_slice %1 {offsets = [0, 0], sizes = [1, 768], strides = [1, 1]} : vector<4x768xf32> to vector<1x768xf32>
    %5 = vector.broadcast %3 : vector<8x1xf32> to vector<8x768xf32>
    %6 = vector.broadcast %4 : vector<1x768xf32> to vector<8x768xf32>
    %7 = arith.mulf %5, %6 : vector<8x768xf32>
    %8 = vector.extract_strided_slice %2 {offsets = [0, 1], sizes = [8, 1], strides = [1, 1]} : vector<8x4xf32> to vector<8x1xf32>
    %9 = vector.extract_strided_slice %1 {offsets = [1, 0], sizes = [1, 768], strides = [1, 1]} : vector<4x768xf32> to vector<1x768xf32>
    %10 = vector.broadcast %8 : vector<8x1xf32> to vector<8x768xf32>
    %11 = vector.broadcast %9 : vector<1x768xf32> to vector<8x768xf32>
    %12 = arith.mulf %10, %11 : vector<8x768xf32>
    %13 = arith.addf %7, %12 : vector<8x768xf32>
    %14 = vector.extract_strided_slice %2 {offsets = [0, 2], sizes = [8, 1], strides = [1, 1]} : vector<8x4xf32> to vector<8x1xf32>
    %15 = vector.extract_strided_slice %1 {offsets = [2, 0], sizes = [1, 768], strides = [1, 1]} : vector<4x768xf32> to vector<1x768xf32>
    %16 = vector.broadcast %14 : vector<8x1xf32> to vector<8x768xf32>
    %17 = vector.broadcast %15 : vector<1x768xf32> to vector<8x768xf32>
    %18 = arith.mulf %16, %17 : vector<8x768xf32>
    %19 = arith.addf %13, %18 : vector<8x768xf32>
    %20 = vector.extract_strided_slice %2 {offsets = [0, 3], sizes = [8, 1], strides = [1, 1]} : vector<8x4xf32> to vector<8x1xf32>
    %21 = vector.extract_strided_slice %1 {offsets = [3, 0], sizes = [1, 768], strides = [1, 1]} : vector<4x768xf32> to vector<1x768xf32>
    %22 = vector.broadcast %20 : vector<8x1xf32> to vector<8x768xf32>
    %23 = vector.broadcast %21 : vector<1x768xf32> to vector<8x768xf32>
    %24 = arith.mulf %22, %23 : vector<8x768xf32>
    %25 = arith.addf %19, %24 : vector<8x768xf32>
    %c0_4 = arith.constant 0 : index
    %c0_5 = arith.constant 0 : index
    %26 = vector.load %arg4[%c0_4, %c0_5] : memref<8x1xf32, #tpu.memory_space<vmem>>, vector<8x1xf32>
    %27 = vector.broadcast %26 : vector<8x1xf32> to vector<8x768xf32>
    %28 = arith.addf %25, %27 : vector<8x768xf32>
    %cst = arith.constant 5.000000e-01 : f32
    %29 = vector.broadcast %cst : f32 to vector<8x768xf32>
    %30 = arith.mulf %29, %28 : vector<8x768xf32>
    %31 = math.tanh %30 : vector<8x768xf32>
    %cst_6 = arith.constant 1.000000e+00 : f32
    %32 = vector.broadcast %cst_6 : f32 to vector<8x768xf32>
    %33 = arith.addf %32, %31 : vector<8x768xf32>
    %cst_7 = arith.constant 5.000000e-01 : f32
    %34 = vector.broadcast %cst_7 : f32 to vector<8x768xf32>
    %35 = arith.mulf %34, %33 : vector<8x768xf32>
    %36 = arith.mulf %28, %35 : vector<8x768xf32>
    %c0_8 = arith.constant 0 : index
    %c0_9 = arith.constant 0 : index
    %37 = vector.load %arg5[%c0_8, %c0_9] : memref<4x8xf32, #tpu.memory_space<vmem>>, vector<4x8xf32>
    %38 = vector.extract_strided_slice %37 {offsets = [0, 0], sizes = [4, 1], strides = [1, 1]} : vector<4x8xf32> to vector<4x1xf32>
    %39 = vector.extract_strided_slice %36 {offsets = [0, 0], sizes = [1, 768], strides = [1, 1]} : vector<8x768xf32> to vector<1x768xf32>
    %40 = vector.broadcast %38 : vector<4x1xf32> to vector<4x768xf32>
    %41 = vector.broadcast %39 : vector<1x768xf32> to vector<4x768xf32>
    %42 = arith.mulf %40, %41 : vector<4x768xf32>
    %43 = vector.extract_strided_slice %37 {offsets = [0, 1], sizes = [4, 1], strides = [1, 1]} : vector<4x8xf32> to vector<4x1xf32>
    %44 = vector.extract_strided_slice %36 {offsets = [1, 0], sizes = [1, 768], strides = [1, 1]} : vector<8x768xf32> to vector<1x768xf32>
    %45 = vector.broadcast %43 : vector<4x1xf32> to vector<4x768xf32>
    %46 = vector.broadcast %44 : vector<1x768xf32> to vector<4x768xf32>
    %47 = arith.mulf %45, %46 : vector<4x768xf32>
    %48 = arith.addf %42, %47 : vector<4x768xf32>
    %49 = vector.extract_strided_slice %37 {offsets = [0, 2], sizes = [4, 1], strides = [1, 1]} : vector<4x8xf32> to vector<4x1xf32>
    %50 = vector.extract_strided_slice %36 {offsets = [2, 0], sizes = [1, 768], strides = [1, 1]} : vector<8x768xf32> to vector<1x768xf32>
    %51 = vector.broadcast %49 : vector<4x1xf32> to vector<4x768xf32>
    %52 = vector.broadcast %50 : vector<1x768xf32> to vector<4x768xf32>
    %53 = arith.mulf %51, %52 : vector<4x768xf32>
    %54 = arith.addf %48, %53 : vector<4x768xf32>
    %55 = vector.extract_strided_slice %37 {offsets = [0, 3], sizes = [4, 1], strides = [1, 1]} : vector<4x8xf32> to vector<4x1xf32>
    %56 = vector.extract_strided_slice %36 {offsets = [3, 0], sizes = [1, 768], strides = [1, 1]} : vector<8x768xf32> to vector<1x768xf32>
    %57 = vector.broadcast %55 : vector<4x1xf32> to vector<4x768xf32>
    %58 = vector.broadcast %56 : vector<1x768xf32> to vector<4x768xf32>
    %59 = arith.mulf %57, %58 : vector<4x768xf32>
    %60 = arith.addf %54, %59 : vector<4x768xf32>
    %61 = vector.extract_strided_slice %37 {offsets = [0, 4], sizes = [4, 1], strides = [1, 1]} : vector<4x8xf32> to vector<4x1xf32>
    %62 = vector.extract_strided_slice %36 {offsets = [4, 0], sizes = [1, 768], strides = [1, 1]} : vector<8x768xf32> to vector<1x768xf32>
    %63 = vector.broadcast %61 : vector<4x1xf32> to vector<4x768xf32>
    %64 = vector.broadcast %62 : vector<1x768xf32> to vector<4x768xf32>
    %65 = arith.mulf %63, %64 : vector<4x768xf32>
    %66 = arith.addf %60, %65 : vector<4x768xf32>
    %67 = vector.extract_strided_slice %37 {offsets = [0, 5], sizes = [4, 1], strides = [1, 1]} : vector<4x8xf32> to vector<4x1xf32>
    %68 = vector.extract_strided_slice %36 {offsets = [5, 0], sizes = [1, 768], strides = [1, 1]} : vector<8x768xf32> to vector<1x768xf32>
    %69 = vector.broadcast %67 : vector<4x1xf32> to vector<4x768xf32>
    %70 = vector.broadcast %68 : vector<1x768xf32> to vector<4x768xf32>
    %71 = arith.mulf %69, %70 : vector<4x768xf32>
    %72 = arith.addf %66, %71 : vector<4x768xf32>
    %73 = vector.extract_strided_slice %37 {offsets = [0, 6], sizes = [4, 1], strides = [1, 1]} : vector<4x8xf32> to vector<4x1xf32>
    %74 = vector.extract_strided_slice %36 {offsets = [6, 0], sizes = [1, 768], strides = [1, 1]} : vector<8x768xf32> to vector<1x768xf32>
    %75 = vector.broadcast %73 : vector<4x1xf32> to vector<4x768xf32>
    %76 = vector.broadcast %74 : vector<1x768xf32> to vector<4x768xf32>
    %77 = arith.mulf %75, %76 : vector<4x768xf32>
    %78 = arith.addf %72, %77 : vector<4x768xf32>
    %79 = vector.extract_strided_slice %37 {offsets = [0, 7], sizes = [4, 1], strides = [1, 1]} : vector<4x8xf32> to vector<4x1xf32>
    %80 = vector.extract_strided_slice %36 {offsets = [7, 0], sizes = [1, 768], strides = [1, 1]} : vector<8x768xf32> to vector<1x768xf32>
    %81 = vector.broadcast %79 : vector<4x1xf32> to vector<4x768xf32>
    %82 = vector.broadcast %80 : vector<1x768xf32> to vector<4x768xf32>
    %83 = arith.mulf %81, %82 : vector<4x768xf32>
    %84 = arith.addf %78, %83 : vector<4x768xf32>
    %c0_10 = arith.constant 0 : index
    %c0_11 = arith.constant 0 : index
    %85 = vector.load %arg6[%c0_10, %c0_11] : memref<4x1xf32, #tpu.memory_space<vmem>>, vector<4x1xf32>
    %86 = vector.broadcast %85 : vector<4x1xf32> to vector<4x768xf32>
    %87 = arith.addf %84, %86 : vector<4x768xf32>
    %cst_12 = arith.constant 5.000000e-01 : f32
    %88 = vector.broadcast %cst_12 : f32 to vector<4x768xf32>
    %89 = arith.mulf %88, %87 : vector<4x768xf32>
    %90 = math.tanh %89 : vector<4x768xf32>
    %cst_13 = arith.constant 1.000000e+00 : f32
    %91 = vector.broadcast %cst_13 : f32 to vector<4x768xf32>
    %92 = arith.addf %91, %90 : vector<4x768xf32>
    %cst_14 = arith.constant 5.000000e-01 : f32
    %93 = vector.broadcast %cst_14 : f32 to vector<4x768xf32>
    %94 = arith.mulf %93, %92 : vector<4x768xf32>
    %95 = arith.mulf %87, %94 : vector<4x768xf32>
    %c0_15 = arith.constant 0 : index
    %c0_16 = arith.constant 0 : index
    %96 = vector.load %arg7[%c0_15, %c0_16] : memref<4x4xf32, #tpu.memory_space<vmem>>, vector<4x4xf32>
    %97 = vector.extract_strided_slice %96 {offsets = [0, 0], sizes = [4, 1], strides = [1, 1]} : vector<4x4xf32> to vector<4x1xf32>
    %98 = vector.extract_strided_slice %1 {offsets = [0, 0], sizes = [1, 768], strides = [1, 1]} : vector<4x768xf32> to vector<1x768xf32>
    %99 = vector.broadcast %97 : vector<4x1xf32> to vector<4x768xf32>
    %100 = vector.broadcast %98 : vector<1x768xf32> to vector<4x768xf32>
    %101 = arith.mulf %99, %100 : vector<4x768xf32>
    %102 = vector.extract_strided_slice %96 {offsets = [0, 1], sizes = [4, 1], strides = [1, 1]} : vector<4x4xf32> to vector<4x1xf32>
    %103 = vector.extract_strided_slice %1 {offsets = [1, 0], sizes = [1, 768], strides = [1, 1]} : vector<4x768xf32> to vector<1x768xf32>
    %104 = vector.broadcast %102 : vector<4x1xf32> to vector<4x768xf32>
    %105 = vector.broadcast %103 : vector<1x768xf32> to vector<4x768xf32>
    %106 = arith.mulf %104, %105 : vector<4x768xf32>
    %107 = arith.addf %101, %106 : vector<4x768xf32>
    %108 = vector.extract_strided_slice %96 {offsets = [0, 2], sizes = [4, 1], strides = [1, 1]} : vector<4x4xf32> to vector<4x1xf32>
    %109 = vector.extract_strided_slice %1 {offsets = [2, 0], sizes = [1, 768], strides = [1, 1]} : vector<4x768xf32> to vector<1x768xf32>
    %110 = vector.broadcast %108 : vector<4x1xf32> to vector<4x768xf32>
    %111 = vector.broadcast %109 : vector<1x768xf32> to vector<4x768xf32>
    %112 = arith.mulf %110, %111 : vector<4x768xf32>
    %113 = arith.addf %107, %112 : vector<4x768xf32>
    %114 = vector.extract_strided_slice %96 {offsets = [0, 3], sizes = [4, 1], strides = [1, 1]} : vector<4x4xf32> to vector<4x1xf32>
    %115 = vector.extract_strided_slice %1 {offsets = [3, 0], sizes = [1, 768], strides = [1, 1]} : vector<4x768xf32> to vector<1x768xf32>
    %116 = vector.broadcast %114 : vector<4x1xf32> to vector<4x768xf32>
    %117 = vector.broadcast %115 : vector<1x768xf32> to vector<4x768xf32>
    %118 = arith.mulf %116, %117 : vector<4x768xf32>
    %119 = arith.addf %113, %118 : vector<4x768xf32>
    %c0_17 = arith.constant 0 : index
    %c0_18 = arith.constant 0 : index
    %120 = vector.load %arg8[%c0_17, %c0_18] : memref<4x1xf32, #tpu.memory_space<vmem>>, vector<4x1xf32>
    %121 = vector.broadcast %120 : vector<4x1xf32> to vector<4x768xf32>
    %122 = arith.addf %119, %121 : vector<4x768xf32>
    %cst_19 = arith.constant 5.000000e-01 : f32
    %123 = vector.broadcast %cst_19 : f32 to vector<4x768xf32>
    %124 = arith.mulf %123, %122 : vector<4x768xf32>
    %125 = math.tanh %124 : vector<4x768xf32>
    %cst_20 = arith.constant 1.000000e+00 : f32
    %126 = vector.broadcast %cst_20 : f32 to vector<4x768xf32>
    %127 = arith.addf %126, %125 : vector<4x768xf32>
    %cst_21 = arith.constant 5.000000e-01 : f32
    %128 = vector.broadcast %cst_21 : f32 to vector<4x768xf32>
    %129 = arith.mulf %128, %127 : vector<4x768xf32>
    %130 = arith.mulf %122, %129 : vector<4x768xf32>
    %131 = arith.mulf %95, %130 : vector<4x768xf32>
    %132 = arith.addf %1, %131 : vector<4x768xf32>
    %c0_22 = arith.constant 0 : index
    %c0_23 = arith.constant 0 : index
    %c0_24 = arith.constant 0 : index
    %133 = vector.load %arg9[%c0_22, %c0_23, %c0_24] : memref<1x4x768xf32, #tpu.memory_space<vmem>>, vector<1x4x768xf32>
    %134 = vector.shape_cast %133 : vector<1x4x768xf32> to vector<4x768xf32>
    %135 = vector.shape_cast %132 : vector<4x768xf32> to vector<1x4x768xf32>
    tpu.vector_store %arg9[%c0_22, %c0_23, %c0_24], %135 {strides = array<i32>} : memref<1x4x768xf32, #tpu.memory_space<vmem>>, vector<1x4x768xf32>,
    return
  }
  func.func @transform_0(%arg0: i32, %arg1: i32) -> (i32, i32, i32) {
    %c0_i32 = arith.constant 0 : i32
    %c0_i32_0 = arith.constant 0 : i32
    return %arg0, %c0_i32, %arg1 : i32, i32, i32
  }
  func.func @transform_1(%arg0: i32, %arg1: i32) -> (i32, i32) {
    %c0_i32 = arith.constant 0 : i32
    %c0_i32_0 = arith.constant 0 : i32
    %c0_i32_1 = arith.constant 0 : i32
    return %c0_i32, %c0_i32_0 : i32, i32
  }
  func.func @transform_2(%arg0: i32, %arg1: i32) -> (i32, i32) {
    %c0_i32 = arith.constant 0 : i32
    %c0_i32_0 = arith.constant 0 : i32
    %c0_i32_1 = arith.constant 0 : i32
    return %c0_i32, %c0_i32_0 : i32, i32
  }
  func.func @transform_3(%arg0: i32, %arg1: i32) -> (i32, i32) {
    %c0_i32 = arith.constant 0 : i32
    %c0_i32_0 = arith.constant 0 : i32
    %c0_i32_1 = arith.constant 0 : i32
    return %c0_i32, %c0_i32_0 : i32, i32
  }
  func.func @transform_4(%arg0: i32, %arg1: i32) -> (i32, i32) {
    %c0_i32 = arith.constant 0 : i32
    %c0_i32_0 = arith.constant 0 : i32
    %c0_i32_1 = arith.constant 0 : i32
    return %c0_i32, %c0_i32_0 : i32, i32
  }
  func.func @transform_5(%arg0: i32, %arg1: i32) -> (i32, i32) {
    %c0_i32 = arith.constant 0 : i32
    %c0_i32_0 = arith.constant 0 : i32
    %c0_i32_1 = arith.constant 0 : i32
    return %c0_i32, %c0_i32_0 : i32, i32
  }
  func.func @transform_6(%arg0: i32, %arg1: i32) -> (i32, i32) {
    %c0_i32 = arith.constant 0 : i32
    %c0_i32_0 = arith.constant 0 : i32
    %c0_i32_1 = arith.constant 0 : i32
    return %c0_i32, %c0_i32_0 : i32, i32
  }
  func.func @transform_7(%arg0: i32, %arg1: i32) -> (i32, i32, i32) {
    %c0_i32 = arith.constant 0 : i32
    %c0_i32_0 = arith.constant 0 : i32
    return %arg0, %c0_i32, %arg1 : i32, i32, i32
  }
}

</mosaic_0001>

<bundles_post_ra>
// kernel: tpu_custom_call.1
= control target key start
LH: loop header
LB: loop body
LE: loop exit
PB: predicated region body
PF: predicated region fallthrough
CT: control target
= control target key end

     0   :  { %12 = vsyncpa [#allocation3], 0  ;;  %s2115_s0 = inlined_call_operand.hbm [shape: f32[2,4,768], index: 0, kind: input, shape index: {}]   ;;  %s2116_s1 = inlined_call_operand.vmem [shape: f32[8,4], index: 1, kind: input, shape index: {}]   ;;  %s2117_s2 = inlined_call_operand.vmem [shape: f32[8,1], index: 2, kind: input, shape index: {}]   ;;  %s2118_s3 = inlined_call_operand.vmem [shape: f32[4,8], index: 3, kind: input, shape index: {}]   ;;  %s2119_s4 = inlined_call_operand.vmem [shape: f32[4,1], index: 4, kind: input, shape index: {}]   ;;  %s2120_s5 = inlined_call_operand.vmem [shape: f32[4,4], index: 5, kind: input, shape index: {}]   ;;  %s2121_s6 = inlined_call_operand.vmem [shape: f32[4,1], index: 6, kind: input, shape index: {}]   ;;  %s2122_s7 = inlined_call_operand.hbm [shape: f32[2,4,768], index: 7, kind: output, shape index: {}]  }
   0x1   :  { %14 = vsyncpa [#allocation3 + $0x1], 0 }
   0x2   :  { %15 = vsyncpa [#allocation4], 0 }
   0x3   :  { %17 = vsyncpa [#allocation4 + $0x1], 0  ;;  %s1525_s24 = smov 0   ;;  %s1527_s25 = smov 0  }
   0x4   :  { %s1529_s26 = smov 0   ;;  %s1531_s27 = smov 0  }
   0x5   :  { %s1533_s28 = smov 0   ;;  %s1535_s29 = smov 0  }
   0x6 LB: > { %s1224_s30 = sadd.s32 4294967295, %s1473_s29   ;;  %s1225_s8 = sadd.s32 4294967294, %s1473_s29   ;;  %s1473_s29 = sphi %s1535_s29, %s23_s29   ;;  %s1469_s28 = sphi %s1533_s28, %s2199_s28   ;;  %s1465_s27 = sphi %s1531_s27, %s2198_s27   ;;  %s1461_s26 = sphi %s1529_s26, %s2197_s26   ;;  %s1457_s25 = sphi %s1527_s25, %s2196_s25   ;;  %s1453_s24 = sphi %s1525_s24, %s2195_s24  }
   0x7   : > { %s35_s9 = sadd.s32 1, %s1469_s28  ;;  %s44_s10 = sadd.s32 1, %s1461_s26 }
   0x8   : > { %p37_p0 = scmp.ge.s32.totalorder %s35_s9, 2  ;;  %p51_p1 = scmp.ne.s32.totalorder %s1461_s26, %s1457_s25 }
   0x9   : > { %p52_p2 = scmp.eq.s32.totalorder %s1473_s29, 0  ;;  %p57_p3 = scmp.ne.s32.totalorder %s1457_s25, %s1453_s24 }
   0xa   : > { %s2201_s9 = smov (%p37_p0, %s35_s9), 0  ;;  %p58_p5 = scmp.eq.s32.totalorder %s1224_s30, 0 }
   0xb   : > { %2142 = sst [smem:[#allocation8_spill]] %s2201_s9  ;;  %p1566_p4 = por %p52_p2, %p51_p1 }
   0xc   : > { %s39_s12 = ssub.s32 %s1469_s28, %s2201_s9  ;;  %p209_p6 = scmp.eq.s32.totalorder %s1224_s30, 1 }
   0xd   : > { %p42_p7 = scmp.eq.s32.totalorder %s39_s12, 0  ;;  %p1572_p8 = por %p58_p5, %p57_p3 }
   0xe   : > { %p1576_p9 = por %p209_p6, %p51_p1  ;;  %p215_p10 = scmp.eq.s32.totalorder %s1225_s8, 1 }
   0xf   : > { %s1581_s15 = scalar_select %p42_p7, %s1461_s26, %s44_s10  }
  0x10   : > { %s2145_s14 = scalar_select %p1576_p9, 1, 0 }
  0x11   : > { %p1583_p11 = por %p215_p10, %p57_p3  ;;  %p1249_p13 = scmp.lt.s32.totalorder %s1473_s29, 2 }
  0x12   : > { %s253_s17 = sand.u32 1, %s1461_s26   ;;  %s1234_s19 = smul.u32 384, %s1469_s28 }
  0x13   : > { %s2146_s16 = scalar_select %p1583_p11, 1, 0 }
  0x14   : > { %s1233_s18 = smul.u32 24, %s253_s17  ;;  %p1593_p0 = pnand %p1249_p13, %p1566_p4 }
  0x15   : > { %s1601_s23 = scalar_lea.hbm %s2115_s0, %s1234_s19  ;;  %s254_s10 = scalar_lea.sflag [#allocation3], %s253_s17 }
  0x16   : > { %s257_s30 = scalar_lea.vmem [#allocation2], %s1233_s18  ;;  %s1361_s11 = scalar_lea.hbm %s1601_s23, 384 }
  0x17   : > { %s267_s8 = sshll.u32 %s257_s30, 4  ;;  %p1362_p2 = scmp.ne.s32.totalorder %s1601_s23, %s1361_s11  ;;  %s1603_s8 = int_to_ptr.vmem [resolvable:$true] %s267_s8 }
  0x18   : > { %p1363_p3 = pneg %p1593_p0  ;;  %s1366_s21 = scalar_lea.hbm %s2115_s0, 768 }
  0x19   : > { %p1367_p6 = scmp.lt.u32.totalorder %s1601_s23, %s2115_s0  ;;  %p1368_p7 = scmp.lt.u32.totalorder %s1366_s21, %s1361_s11 }
  0x1a   : > { %p1364_p4 = pnand %p1363_p3, %p1362_p2  ;;  %p1370_p13 = scmp.lt.u32.totalorder %s1361_s11, %s1601_s23 }
  0x1b   : > { %p1369_p10 = por %p1368_p7, %p1367_p6 }
  0x1c   : > { %p1365_p5 = pneg %p1364_p4 }
  0x1d   : > { %p1371_p12 = por %p1370_p13, %p1369_p10 }
  0x1f   : > { %p1372_p1 = pnand %p1371_p12, %p1365_p5 }
  0x21   : > { %1375 = shalt.err (!%p1372_p1)
}
  0x22   : > { %s1376_s17 = scalar_lea.vmem %s1603_s8, 384  ;;  %s1475_s18 = smov [#allocation2]  }
  0x23   : > { %p1377_p2 = scmp.ne.s32.totalorder %s1603_s8, %s1376_s17  ;;  %s1381_s30 = sshll.u32 %s1475_s18, 4  ;;  %s1382_s30 = int_to_ptr.vmem [resolvable:$false] %s1381_s30 }
  0x24   : > { %s1383_s9 = scalar_lea.vmem %s1382_s30, 768  ;;  %p1384_p9 = scmp.lt.s32.totalorder %s1603_s8, %s1382_s30 }
  0x25   : > { %p1379_p4 = pnand %p1377_p2, %p1363_p3  ;;  %p1385_p6 = scmp.lt.s32.totalorder %s1383_s9, %s1376_s17 }
  0x27   : > { %p1380_p11 = pneg %p1379_p4  ;;  %p1386_p7 = por %p1385_p6, %p1384_p9 }
  0x29   : > { %p1387_p10 = pnand %p1386_p7, %p1380_p11 }
  0x2b   : > { %1390 = shalt.err (!%p1387_p10)
}
  0x2c   : > { %1244 = dma.hbm_to_vmem [thread:$0]  (!%p1593_p0), %s1601_s23, 384, %s1603_s8, %s254_s10  }
  0x2d   : > { %p272_p12 = scmp.lt.s32.totalorder %s1473_s29, 3  ;;  %p2148_p1 = scmp.ge.s32.totalorder %s1473_s29, 1 }
  0x2f   : > { %p273_p3 = pnand %p2148_p1, %p272_p12 }
  0x31   : > { %276 = sbr.rel (%p273_p3) target bundleno = 318 (0x13e), region = 48 }
  0x38   : > { %s1634_s11 = sand.u32 1, %s1457_s25  }
  0x39   : > { %s1235_s12 = smul.u32 24, %s1634_s11  ;;  %s279_s19 = scalar_lea.sflag [#allocation3], %s1634_s11 }
  0x3b   : > { %s1640_s20 = scalar_lea.vmem [#allocation2], %s1235_s12 }
  0x3c   : > { %1444 = dma.done.wait (%p1572_p8), %s279_s19, 384  }
  0x3d   : > { %1446 = vsyncadd (%p1572_p8), %s279_s19, 4294966912  ;;  %v1476_v0 = vmov 2   ;;  %v1477_v1 = vmov 0   ;;  %v318_v2 = vld [vmem:[%s2116_s1] sm:$0xff]  ;;  %v1478_v3 = vmov 3   ;;  %v1479_v4 = vmov 1  }
  0x3e   : > { %1309 = vset.pattern.permute.xlu1 %v1476_v0  ;;  %1307 = vset.pattern.permute.xlu0 %v1477_v1  ;;  %v597_v5 = vld [vmem:[%s2117_s2] sm:$0xff]  ;;  %v1480_v8 = vmov 4   ;;  %v1481_v10 = vmov 5   ;;  %v1482_v11 = vmov 6   ;;  %v1483_v12 = vmov 7   ;;  %v1675_v20 = vld [vmem:[%s1640_s20 + $0x10] sm:$0xff] }
  0x3f   : > { %458 = vperm.xlu1 %1309, %v318_v2   ;;  %321 = vperm.xlu0 %1307, %v318_v2   ;;  %v639_v6 = vld [vmem:[%s2118_s3] sm:$0xf]  ;;  %v327_v14 = vlaneseq  ;;  %2152 = vst [vmem:[#allocation12_spill] sm:$0xff] %v1675_v20  ;;  %s312_s8 = scalar_lea.vmem [#allocation5], %s1235_s12  ;;  %p2191_p9 = scmp.ne.s32.totalorder %s2145_s14, 0 }
  0x40   : > { %v997_v7 = vld [vmem:[%s2120_s5] sm:$0xf]  ;;  %s1140_s10 = sshll.u32 %s312_s8, 4  ;;  %s1484_s17 = smov [#allocation5]   ;;  %s2068_s10 = int_to_ptr.vmem [resolvable:$true] %s1140_s10 }
  0x41   : > { %v955_v9 = vld [vmem:[%s2119_s4] sm:$0xf]  ;;  %v328_v15 = vshrl.u32 %v327_v14, 7  ;;  %s1391_s12 = scalar_lea.vmem %s2068_s10, 384  ;;  %s1395_s18 = sshll.u32 %s1484_s17, 4  ;;  %s1396_s18 = int_to_ptr.vmem [resolvable:$false] %s1395_s18 }
  0x42   : > { %v1057_v13 = vld [vmem:[%s2121_s6] sm:$0xf]  ;;  %p1392_p8 = scmp.ne.s32.totalorder %s2068_s10, %s1391_s12  ;;  %s1397_s30 = scalar_lea.vmem %s1396_s18, 768 }
  0x43   : > { %1310 = vset.pattern.permute.xlu1 %v1478_v3  ;;  %1308 = vset.pattern.permute.xlu0 %v1479_v4  ;;  %v1664_v16 = vsub.s32 2, %v328_v15  ;;  %v1666_v17 = vsub.s32 6, %v328_v15  ;;  %v1669_v18 = vld [vmem:[%s1640_s20] sm:$0xff]  ;;  %v1672_v19 = vld [vmem:[%s1640_s20 + $0x8] sm:$0xff]  ;;  %v1677_v21 = vsub.s32 0, %v328_v15  ;;  %v1679_v22 = vsub.s32 4, %v328_v15  ;;  %p1398_p5 = scmp.lt.s32.totalorder %s2068_s10, %s1396_s18  ;;  %p1399_p13 = scmp.lt.s32.totalorder %s1397_s30, %s1391_s12 }
  0x44   : > { %528 = vperm.xlu1 %1310, %v318_v2   ;;  %388 = vperm.xlu0 %1308, %v318_v2   ;;  %2150 = vst [vmem:[#allocation10_spill] sm:$0xff] %v1669_v18  ;;  %2151 = vst [vmem:[#allocation11_spill] sm:$0xff] %v1672_v19  ;;  %v1700_v32 = vsub.s32 3, %v328_v15  ;;  %v1702_v33 = vsub.s32 7, %v328_v15  ;;  %v1704_v34 = vsub.s32 1, %v328_v15  ;;  %v1715_v38 = vsub.s32 5, %v328_v15  ;;  %p1393_p11 = pnand %p1392_p8, %p2191_p9 }
  0x45   : > { %2149 = vst [vmem:[#allocation9_spill] sm:$0xff] %v1666_v17  ;;  %v464_v23 = vrot.slane %v1669_v18, %v1664_v16  ;;  %v468_v24 = vrot.slane %v1669_v18, %v1666_v17  ;;  %v472_v25 = vrot.slane %v1672_v19, %v1664_v16  ;;  %v476_v26 = vrot.slane %v1672_v19, %v1666_v17  ;;  %s1236_s20 = smul.u32 384, %s1465_s27  ;;  %s1124_s27 = scalar_lea.sflag [#allocation4], %s1634_s11 }
  0x46   : > { %v480_v27 = vrot.slane %v1675_v20, %v1664_v16  ;;  %v484_v28 = vrot.slane %v1675_v20, %v1666_v17  ;;  %v330_v29 = vrot.slane %v1669_v18, %v1677_v21  ;;  %v334_v30 = vrot.slane %v1669_v18, %v1679_v22  ;;  %2153 = vst [vmem:[#allocation13_spill] sm:$0xff] %v1702_v33  ;;  %p1394_p0 = pneg %p1393_p11  ;;  %p1400_p2 = por %p1399_p13, %p1398_p5 }
  0x47   : > { %v1698_v31 = vrot.slane %v464_v23, %v1664_v16  ;;  %v1707_v35 = vrot.slane %v468_v24, %v1664_v16  ;;  %v1710_v36 = vrot.slane %v472_v25, %v1664_v16  ;;  %v1713_v37 = vrot.slane %v476_v26, %v1664_v16  ;;  %s2066_s22 = scalar_lea.hbm %s2122_s7, %s1236_s20 }
  0x48   : > { %1311 = vset.pattern.permute.xlu1 %v1477_v1  ;;  %1314 = vset.pattern.permute.xlu0 %v1478_v3  ;;  %v1718_v39 = vrot.slane %v480_v27, %v1664_v16  ;;  %v1721_v40 = vrot.slane %v484_v28, %v1664_v16  ;;  %v338_v41 = vrot.slane %v1672_v19, %v1677_v21  ;;  %p1401_p4 = pnand %p1400_p2, %p1394_p0 }
  0x49   : > { %600 = vperm.xlu1 %1311, %v597_v5   ;;  %756 = vperm.xlu0 %1314, %v639_v6   ;;  %v342_v42 = vrot.slane %v1672_v19, %v1679_v22  ;;  %v346_v43 = vrot.slane %v1675_v20, %v1677_v21  ;;  %v350_v44 = vrot.slane %v1675_v20, %v1679_v22 }
  0x4a   : > { %v1732_v45 = vrot.slane %v330_v29, %v1677_v21  ;;  %v1735_v46 = vrot.slane %v334_v30, %v1677_v21  ;;  %v534_v47 = vrot.slane %v1669_v18, %v1700_v32  ;;  %v538_v48 = vrot.slane %v1669_v18, %v1702_v33 }
  0x4b   : > { %v542_v49 = vrot.slane %v1672_v19, %v1700_v32  ;;  %v546_v50 = vrot.slane %v1672_v19, %v1702_v33  ;;  %v550_v51 = vrot.slane %v1675_v20, %v1700_v32  ;;  %v554_v52 = vrot.slane %v1675_v20, %v1702_v33 }
  0x4c   : > { %v394_v53 = vrot.slane %v1669_v18, %v1704_v34  ;;  %v398_v54 = vrot.slane %v1669_v18, %v1715_v38  ;;  %v402_v55 = vrot.slane %v1672_v19, %v1704_v34  ;;  %v406_v56 = vrot.slane %v1672_v19, %v1715_v38 }
  0x4d   : > { %1312 = vset.pattern.permute.xlu1 %v1479_v4  ;;  %1315 = vset.pattern.permute.xlu0 %v1477_v1  ;;  %v410_v57 = vrot.slane %v1675_v20, %v1704_v34  ;;  %v414_v58 = vrot.slane %v1675_v20, %v1715_v38  ;;  %v1762_v61 = vrot.slane %v338_v41, %v1677_v21 }
  0x4e   : > { %676 = vperm.xlu1 %1312, %v639_v6   ;;  %642 = vperm.xlu0 %1315, %v639_v6   ;;  %v1765_v62 = vrot.slane %v342_v42, %v1677_v21  ;;  %v1768_v63 = vrot.slane %v346_v43, %v1677_v21  ;;  %v1777_v2 = vrot.slane %v538_v48, %v1700_v32 }
  0x4f   : > { %v1786_v5 = vrot.slane %v550_v51, %v1700_v32 }
  0x50   : > { %2155 = vst [vmem:[#allocation15_spill] sm:$0xff] %v1777_v2 }
  0x51   : > { %2158 = vst [vmem:[#allocation18_spill] sm:$0xff] %v1786_v5 }
  0x52   : > { %1313 = vset.pattern.permute.xlu1 %v1476_v0  ;;  %1000 = vperm.xlu0 %1315, %v997_v7  }
  0x53   : > { %716 = vperm.xlu1 %1313, %v639_v6  }
  0x56   : > { %1320 = vset.pattern.permute.xlu0 %v1476_v0  ;;  %v1771_v0 = vrot.slane %v350_v44, %v1677_v21 }
  0x57   : > { %1316 = vset.pattern.permute.xlu1 %v1480_v8  ;;  %1026 = vperm.xlu0 %1320, %v997_v7   ;;  %v1795_v8 = vrot.slane %v398_v54, %v1704_v34 }
  0x58   : > { %796 = vperm.xlu1 %1316, %v639_v6  }
  0x5b   : > { %1323 = vset.pattern.permute.xlu0 %v1477_v1 }
  0x5c   : > { %1317 = vset.pattern.permute.xlu1 %v1481_v10  ;;  %958 = vperm.xlu0 %1323, %v955_v9   ;;  %v1798_v9 = vrot.slane %v402_v55, %v1704_v34  ;;  %v1801_v10 = vrot.slane %v406_v56, %v1704_v34 }
  0x5d   : > { %836 = vperm.xlu1 %1317, %v639_v6  }
  0x61   : > { %1318 = vset.pattern.permute.xlu1 %v1479_v4  ;;  %v1783_v4 = vrot.slane %v546_v50, %v1700_v32 }
  0x62   : > { %1010 = vperm.xlu1 %1318, %v997_v7  }
  0x63   : > { %2157 = vst [vmem:[#allocation17_spill] sm:$0xff] %v1783_v4 }
  0x66   : > { %1319 = vset.pattern.permute.xlu1 %v1482_v11  ;;  %v1804_v11 = vrot.slane %v410_v57, %v1704_v34 }
  0x67   : > { %876 = vperm.xlu1 %1319, %v639_v6  }
  0x68   : > { %2160 = vst [vmem:[#allocation20_spill] sm:$0xff] %v1804_v11 }
  0x6b   : > { %1321 = vset.pattern.permute.xlu1 %v1483_v12  ;;  %v1807_v12 = vrot.slane %v414_v58, %v1704_v34 }
  0x6c   : > { %916 = vperm.xlu1 %1321, %v639_v6   ;;  %v1789_v6 = vrot.slane %v554_v52, %v1700_v32 }
  0x6d   : > { %2161 = vst [vmem:[#allocation21_spill] sm:$0xff] %v1807_v12 }
  0x6e   : > { %2159 = vst [vmem:[#allocation19_spill] sm:$0xff] %v1789_v6 }
  0x70   : > { %1322 = vset.pattern.permute.xlu1 %v1478_v3  ;;  %v1780_v3 = vrot.slane %v542_v49, %v1700_v32 }
  0x71   : > { %1042 = vperm.xlu1 %1322, %v997_v7   ;;  %v1792_v7 = vrot.slane %v394_v53, %v1704_v34 }
  0x72   : > { %2156 = vst [vmem:[#allocation16_spill] sm:$0xff] %v1780_v3 }
  0x75   : > { %1324 = vset.pattern.permute.xlu1 %v1477_v1  ;;  %v1774_v1 = vrot.slane %v534_v47, %v1700_v32 }
  0x76   : > { %1060 = vperm.xlu1 %1324, %v1057_v13  }
  0x77   : > { %2154 = vst [vmem:[#allocation14_spill] sm:$0xff] %v1774_v1 }
  0xbe   : > { %v459_v59 = vpop.permute.xlu1 %458  ;;  %v322_v60 = vpop.permute.xlu0 %321 }
  0xbf   : > { %v515_v13 = vmul.f32 %v1698_v31, %v459_v59  ;;  %v516_v14 = vmul.f32 %v1707_v35, %v459_v59  ;;  %v517_v15 = vmul.f32 %v1710_v36, %v459_v59  ;;  %v518_v23 = vmul.f32 %v1713_v37, %v459_v59 }
  0xc0   : > { %v519_v24 = vmul.f32 %v1718_v39, %v459_v59  ;;  %v520_v25 = vmul.f32 %v1721_v40, %v459_v59  ;;  %v381_v26 = vmul.f32 %v1732_v45, %v322_v60  ;;  %v382_v27 = vmul.f32 %v1735_v46, %v322_v60 }
  0xc1   : > { %v383_v30 = vmul.f32 %v1762_v61, %v322_v60  ;;  %v384_v41 = vmul.f32 %v1765_v62, %v322_v60  ;;  %v385_v42 = vmul.f32 %v1768_v63, %v322_v60  ;;  %v386_v43 = vmul.f32 %v1771_v0, %v322_v60 }
  0xc3   : > { %v529_v28 = vpop.permute.xlu1 %528  ;;  %v389_v29 = vpop.permute.xlu0 %388 }
  0xc4   : > { %v585_v44 = vmul.f32 %v1774_v1, %v529_v28  ;;  %v586_v47 = vmul.f32 %v1777_v2, %v529_v28  ;;  %v445_v48 = vmul.f32 %v1792_v7, %v389_v29  ;;  %v446_v49 = vmul.f32 %v1795_v8, %v389_v29 }
  0xc5   : > { %v447_v50 = vmul.f32 %v1798_v9, %v389_v29  ;;  %v448_v51 = vmul.f32 %v1801_v10, %v389_v29  ;;  %v449_v52 = vmul.f32 %v1804_v11, %v389_v29  ;;  %v450_v53 = vmul.f32 %v1807_v12, %v389_v29 }
  0xc6   : > { %v587_v54 = vmul.f32 %v1780_v3, %v529_v28  ;;  %v588_v55 = vmul.f32 %v1783_v4, %v529_v28  ;;  %v451_v56 = vadd.f32 %v445_v48, %v381_v26  ;;  %v452_v57 = vadd.f32 %v446_v49, %v382_v27 }
  0xc7   : > { %v453_v58 = vadd.f32 %v447_v50, %v383_v30  ;;  %v454_v59 = vadd.f32 %v448_v51, %v384_v41  ;;  %v455_v60 = vadd.f32 %v449_v52, %v385_v42  ;;  %v456_v20 = vadd.f32 %v450_v53, %v386_v43 }
  0xc8   : > { %v589_v19 = vmul.f32 %v1786_v5, %v529_v28  ;;  %v590_v18 = vmul.f32 %v1789_v6, %v529_v28  ;;  %v521_v2 = vadd.f32 %v515_v13, %v451_v56  ;;  %v522_v1 = vadd.f32 %v516_v14, %v452_v57  ;;  %v1833_v33 = vpop.permute.xlu0 %756  ;;  %v601_v26 = vpop.permute.xlu1 %600 }
  0xc9   : > { %v523_v17 = vadd.f32 %v517_v15, %v453_v58  ;;  %v524_v29 = vadd.f32 %v518_v23, %v454_v59  ;;  %v525_v12 = vadd.f32 %v519_v24, %v455_v60  ;;  %v526_v3 = vadd.f32 %v520_v25, %v456_v20 }
  0xca   : > { %v591_v11 = vadd.f32 %v585_v44, %v521_v2  ;;  %v592_v4 = vadd.f32 %v586_v47, %v522_v1 }
  0xcb   : > { %v593_v27 = vadd.f32 %v587_v54, %v523_v17  ;;  %v594_v30 = vadd.f32 %v588_v55, %v524_v29  ;;  %v595_v41 = vadd.f32 %v589_v19, %v525_v12  ;;  %v596_v42 = vadd.f32 %v590_v18, %v526_v3 }
  0xcc   : > { %v603_v43 = vadd.f32 %v601_v26, %v591_v11  ;;  %v604_v48 = vadd.f32 %v601_v26, %v592_v4 }
  0xcd   : > { %v605_v49 = vadd.f32 %v601_v26, %v593_v27  ;;  %v606_v50 = vadd.f32 %v601_v26, %v594_v30  ;;  %v607_v28 = vadd.f32 %v601_v26, %v595_v41  ;;  %v608_v13 = vadd.f32 %v601_v26, %v596_v42  ;;  %v1835_v52 = vpop.permute.xlu0 %642  ;;  %v677_v18 = vpop.permute.xlu1 %676 }
  0xce   : > { %v609_v14 = vmul.f32 0.5, %v603_v43  ;;  %v610_v51 = vmul.f32 0.5, %v604_v48 }
  0xcf   : > { %v611_v15 = vmul.f32 0.5, %v605_v49  ;;  %v612_v23 = vmul.f32 0.5, %v606_v50  ;;  %v613_v20 = vmul.f32 0.5, %v607_v28  ;;  %v614_v1 = vmul.f32 0.5, %v608_v13 }
  0xd0   : > { %1325 = vtanh.f32 %v609_v14 }
  0xd1   : > { %1327 = vtanh.f32 %v610_v51  ;;  %v1001_v17 = vpop.permute.xlu0 %1000 }
  0xd2   : > { %1329 = vtanh.f32 %v611_v15  ;;  %v1838_v11 = vmul.f32 %v1001_v17, %v1732_v45  ;;  %v1841_v12 = vmul.f32 %v1001_v17, %v1735_v46  ;;  %v1844_v24 = vmul.f32 %v1001_v17, %v1762_v61  ;;  %v717_v57 = vpop.permute.xlu1 %716 }
  0xd3   : > { %1331 = vtanh.f32 %v612_v23  ;;  %v1847_v47 = vmul.f32 %v1001_v17, %v1765_v62  ;;  %v1850_v53 = vmul.f32 %v1001_v17, %v1768_v63  ;;  %v1853_v54 = vmul.f32 %v1001_v17, %v1771_v0 }
  0xd4   : > { %1333 = vtanh.f32 %v613_v20 }
  0xd5   : > { %1335 = vtanh.f32 %v614_v1  ;;  %2162 = vst [vmem:[#allocation22_spill] sm:$0xff] %v1853_v54 }
  0xd6   : > { %v1027_v2 = vpop.permute.xlu0 %1026 }
  0xd7   : > { %v1856_v46 = vmul.f32 %v1027_v2, %v1698_v31  ;;  %v1859_v61 = vmul.f32 %v1027_v2, %v1707_v35  ;;  %v1862_v60 = vmul.f32 %v1027_v2, %v1710_v36  ;;  %v1865_v63 = vmul.f32 %v1027_v2, %v1713_v37  ;;  %v797_v1 = vpop.permute.xlu1 %796 }
  0xd8   : > { %v1870_v31 = vmul.f32 %v1027_v2, %v1718_v39  ;;  %v1875_v42 = vmul.f32 %v1027_v2, %v1721_v40 }
  0xd9   : > { %2163 = vst [vmem:[#allocation23_spill] sm:$0xff] %v1856_v46  ;;  %2164 = vst [vmem:[#allocation24_spill] sm:$0xff] %v1859_v61 }
  0xda   : > { %v1326_v19 = vpop.eup %1325  ;;  %2165 = vst [vmem:[#allocation25_spill] sm:$0xff] %v1862_v60  ;;  %2166 = vst [vmem:[#allocation26_spill] sm:$0xff] %v1865_v63 }
  0xdb   : > { %v1328_v3 = vpop.eup %1327  ;;  %v621_v4 = vadd.f32 1.0, %v1326_v19  ;;  %2167 = vst [vmem:[#allocation27_spill] sm:$0xff] %v1870_v31  ;;  %2168 = vst [vmem:[#allocation28_spill] sm:$0xff] %v1875_v42 }
  0xdc   : > { %v1330_v25 = vpop.eup %1329  ;;  %v622_v44 = vadd.f32 1.0, %v1328_v3 }
  0xdd   : > { %v1332_v55 = vpop.eup %1331  ;;  %v623_v45 = vadd.f32 1.0, %v1330_v25  ;;  %v627_v56 = vmul.f32 0.5, %v621_v4 }
  0xde   : > { %v1334_v58 = vpop.eup %1333  ;;  %v624_v59 = vadd.f32 1.0, %v1332_v55  ;;  %v628_v62 = vmul.f32 0.5, %v622_v44 }
  0xdf   : > { %v1336_v0 = vpop.eup %1335  ;;  %v625_v29 = vadd.f32 1.0, %v1334_v58  ;;  %v629_v26 = vmul.f32 0.5, %v623_v45  ;;  %v1867_v27 = vmul.f32 %v627_v56, %v603_v43 }
  0xe0   : > { %v626_v30 = vadd.f32 1.0, %v1336_v0  ;;  %v630_v35 = vmul.f32 0.5, %v624_v59  ;;  %v1872_v41 = vmul.f32 %v628_v62, %v604_v48 }
  0xe1   : > { %v631_v36 = vmul.f32 0.5, %v625_v29  ;;  %v1877_v14 = vmul.f32 %v629_v26, %v605_v49  ;;  %v682_v37 = vrot.slane %v1867_v27, %v1704_v34  ;;  %v722_v43 = vrot.slane %v1867_v27, %v1664_v16 }
  0xe2   : > { %v632_v51 = vmul.f32 0.5, %v626_v30  ;;  %v1883_v15 = vmul.f32 %v630_v35, %v606_v50  ;;  %v686_v39 = vrot.slane %v1872_v41, %v1704_v34  ;;  %v726_v48 = vrot.slane %v1872_v41, %v1664_v16 }
  0xe3   : > { %2169 = vst [vmem:[#allocation29_spill] sm:$0xff] %v1877_v14  ;;  %v1889_v40 = vmul.f32 %v631_v36, %v607_v28  ;;  %v690_v49 = vrot.slane %v1877_v14, %v1704_v34  ;;  %v703_v23 = vmul.f32 %v682_v37, %v677_v18  ;;  %v730_v20 = vrot.slane %v1877_v14, %v1664_v16 }
  0xe4   : > { %v1895_v17 = vmul.f32 %v632_v51, %v608_v13  ;;  %v694_v50 = vrot.slane %v1883_v15, %v1704_v34  ;;  %v704_v19 = vmul.f32 %v686_v39, %v677_v18  ;;  %v734_v2 = vrot.slane %v1883_v15, %v1664_v16 }
  0xe5   : > { %v698_v28 = vrot.slane %v1889_v40, %v1704_v34  ;;  %v705_v3 = vmul.f32 %v690_v49, %v677_v18  ;;  %v738_v4 = vrot.slane %v1889_v40, %v1664_v16  ;;  %v743_v25 = vmul.f32 %v722_v43, %v717_v57 }
  0xe6   : > { %v702_v44 = vrot.slane %v1895_v17, %v1704_v34  ;;  %v706_v13 = vmul.f32 %v694_v50, %v677_v18  ;;  %v742_v55 = vrot.slane %v1895_v17, %v1664_v16  ;;  %v744_v45 = vmul.f32 %v726_v48, %v717_v57 }
  0xe7   : > { %v707_v56 = vmul.f32 %v698_v28, %v677_v18  ;;  %v745_v58 = vmul.f32 %v730_v20, %v717_v57  ;;  %v746_v59 = vmul.f32 %v734_v2, %v717_v57  ;;  %v747_v62 = vmul.f32 %v738_v4, %v717_v57 }
  0xe8   : > { %v708_v0 = vmul.f32 %v702_v44, %v677_v18  ;;  %v748_v29 = vmul.f32 %v742_v55, %v717_v57  ;;  %v802_v26 = vrot.slane %v1867_v27, %v1679_v22  ;;  %v806_v30 = vrot.slane %v1872_v41, %v1679_v22  ;;  %v1921_v18 = vpop.permute.xlu1 %836 }
  0xe9   : > { %v810_v34 = vrot.slane %v1877_v14, %v1679_v22  ;;  %v814_v35 = vrot.slane %v1883_v15, %v1679_v22  ;;  %v818_v16 = vrot.slane %v1889_v40, %v1679_v22  ;;  %v822_v36 = vrot.slane %v1895_v17, %v1679_v22 }
  0xea   : > { %v823_v57 = vmul.f32 %v802_v26, %v797_v1  ;;  %v824_v37 = vmul.f32 %v806_v30, %v797_v1  ;;  %v762_v43 = vrot.slane %v1867_v27, %v1700_v32  ;;  %v766_v51 = vrot.slane %v1872_v41, %v1700_v32 }
  0xeb   : > { %v825_v39 = vmul.f32 %v810_v34, %v797_v1  ;;  %v826_v48 = vmul.f32 %v814_v35, %v797_v1  ;;  %v827_v49 = vmul.f32 %v818_v16, %v797_v1  ;;  %v828_v20 = vmul.f32 %v822_v36, %v797_v1 }
  0xec   : > { %v770_v50 = vrot.slane %v1877_v14, %v1700_v32  ;;  %v774_v22 = vrot.slane %v1883_v15, %v1700_v32  ;;  %v778_v2 = vrot.slane %v1889_v40, %v1700_v32  ;;  %v782_v28 = vrot.slane %v1895_v17, %v1700_v32 }
  0xed   : > { %v783_v4 = vmul.f32 %v762_v43, %v1833_v33  ;;  %v784_v44 = vmul.f32 %v766_v51, %v1833_v33  ;;  %v648_v55 = vrot.slane %v1867_v27, %v1677_v21  ;;  %v652_v1 = vrot.slane %v1872_v41, %v1677_v21  ;;  %v1011_v51 = vpop.permute.xlu1 %1010 }
  0xee   : > { %v785_v26 = vmul.f32 %v770_v50, %v1833_v33  ;;  %v786_v30 = vmul.f32 %v774_v22, %v1833_v33  ;;  %v787_v34 = vmul.f32 %v778_v2, %v1833_v33  ;;  %v788_v35 = vmul.f32 %v782_v28, %v1833_v33 }
  0xef   : > { %v656_v32 = vrot.slane %v1877_v14, %v1677_v21  ;;  %v660_v16 = vrot.slane %v1883_v15, %v1677_v21  ;;  %v664_v36 = vrot.slane %v1889_v40, %v1677_v21  ;;  %v668_v43 = vrot.slane %v1895_v17, %v1677_v21 }
  0xf0   : > { %v669_v50 = vmul.f32 %v648_v55, %v1835_v52  ;;  %v670_v22 = vmul.f32 %v652_v1, %v1835_v52  ;;  %v842_v33 = vrot.slane %v1867_v27, %v1715_v38  ;;  %v846_v2 = vrot.slane %v1872_v41, %v1715_v38 }
  0xf1   : > { %v671_v28 = vmul.f32 %v656_v32, %v1835_v52  ;;  %v672_v42 = vmul.f32 %v660_v16, %v1835_v52  ;;  %v673_v31 = vmul.f32 %v664_v36, %v1835_v52  ;;  %v674_v63 = vmul.f32 %v668_v43, %v1835_v52 }
  0xf2   : > { %v709_v21 = vadd.f32 %v703_v23, %v669_v50  ;;  %v710_v60 = vadd.f32 %v704_v19, %v670_v22  ;;  %v850_v55 = vrot.slane %v1877_v14, %v1715_v38  ;;  %v854_v1 = vrot.slane %v1883_v15, %v1715_v38  ;;  %v877_v50 = vpop.permute.xlu1 %876 }
  0xf3   : > { %v711_v61 = vadd.f32 %v705_v3, %v671_v28  ;;  %v712_v46 = vadd.f32 %v706_v13, %v672_v42  ;;  %v713_v6 = vadd.f32 %v707_v56, %v673_v31  ;;  %v714_v5 = vadd.f32 %v708_v0, %v674_v63 }
  0xf4   : > { %v749_v54 = vadd.f32 %v743_v25, %v709_v21  ;;  %v750_v32 = vadd.f32 %v744_v45, %v710_v60  ;;  %v858_v16 = vrot.slane %v1889_v40, %v1715_v38  ;;  %v862_v52 = vrot.slane %v1895_v17, %v1715_v38 }
  0xf5   : > { %v751_v23 = vadd.f32 %v745_v58, %v711_v61  ;;  %v752_v19 = vadd.f32 %v746_v59, %v712_v46  ;;  %v753_v36 = vadd.f32 %v747_v62, %v713_v6  ;;  %v754_v43 = vadd.f32 %v748_v29, %v714_v5 }
  0xf6   : > { %v789_v22 = vadd.f32 %v783_v4, %v749_v54  ;;  %v790_v14 = vadd.f32 %v784_v44, %v750_v32  ;;  %v863_v3 = vmul.f32 %v842_v33, %v1921_v18  ;;  %v864_v31 = vmul.f32 %v846_v2, %v1921_v18  ;;  %v2173_v2 = vld [vmem:[#allocation22_spill] sm:$0xff] }
  0xf7   : > { %v791_v63 = vadd.f32 %v785_v26, %v751_v23  ;;  %v792_v42 = vadd.f32 %v786_v30, %v752_v19  ;;  %v793_v60 = vadd.f32 %v787_v34, %v753_v36  ;;  %v794_v25 = vadd.f32 %v788_v35, %v754_v43  ;;  %v2171_v26 = vld [vmem:[#allocation21_spill] sm:$0xff] }
  0xf8   : > { %v829_v13 = vadd.f32 %v823_v57, %v789_v22  ;;  %v830_v45 = vadd.f32 %v824_v37, %v790_v14  ;;  %v865_v56 = vmul.f32 %v850_v55, %v1921_v18  ;;  %v866_v38 = vmul.f32 %v854_v1, %v1921_v18  ;;  %v917_v57 = vpop.permute.xlu1 %916 }
  0xf9   : > { %v831_v46 = vadd.f32 %v825_v39, %v791_v63  ;;  %v832_v6 = vadd.f32 %v826_v48, %v792_v42  ;;  %v833_v5 = vadd.f32 %v827_v49, %v793_v60  ;;  %v834_v61 = vadd.f32 %v828_v20, %v794_v25  ;;  %v2170_v49 = vld [vmem:[#allocation20_spill] sm:$0xff] }
  0xfa   : > { %v867_v54 = vmul.f32 %v858_v16, %v1921_v18  ;;  %v868_v58 = vmul.f32 %v862_v52, %v1921_v18  ;;  %v869_v59 = vadd.f32 %v863_v3, %v829_v13  ;;  %v870_v62 = vadd.f32 %v864_v31, %v830_v45  ;;  %v2175_v16 = vld [vmem:[#allocation13_spill] sm:$0xff]  ;;  %v2177_v13 = vld [vmem:[#allocation15_spill] sm:$0xff] }
  0xfb   : > { %v871_v0 = vadd.f32 %v865_v56, %v831_v46  ;;  %v872_v29 = vadd.f32 %v866_v38, %v832_v6  ;;  %v1013_v4 = vmul.f32 %v1011_v51, %v1792_v7  ;;  %v1014_v14 = vmul.f32 %v1011_v51, %v1795_v8  ;;  %v2172_v8 = vld [vmem:[#allocation9_spill] sm:$0xff]  ;;  %v2178_v38 = vld [vmem:[#allocation16_spill] sm:$0xff] }
  0xfc   : > { %v873_v37 = vadd.f32 %v867_v54, %v833_v5  ;;  %v874_v44 = vadd.f32 %v868_v58, %v834_v61  ;;  %v1015_v39 = vmul.f32 %v1011_v51, %v1798_v9  ;;  %v1016_v48 = vmul.f32 %v1011_v51, %v1801_v10  ;;  %v1043_v23 = vpop.permute.xlu1 %1042  ;;  %v2179_v6 = vld [vmem:[#allocation17_spill] sm:$0xff]  ;;  %v2180_v5 = vld [vmem:[#allocation18_spill] sm:$0xff] }
  0xfd   : > { %v1017_v20 = vmul.f32 %v1011_v51, %v2170_v49  ;;  %v1018_v30 = vmul.f32 %v1011_v51, %v2171_v26  ;;  %v1019_v18 = vadd.f32 %v1013_v4, %v1838_v11  ;;  %v1020_v34 = vadd.f32 %v1014_v14, %v1841_v12  ;;  %v2174_v51 = vld [vmem:[#allocation29_spill] sm:$0xff]  ;;  %v959_v4 = vpop.permute.xlu0 %958 }
  0xfe   : > { %v1021_v35 = vadd.f32 %v1015_v39, %v1844_v24  ;;  %v1022_v7 = vadd.f32 %v1016_v48, %v1847_v47  ;;  %v882_v33 = vrot.slane %v1867_v27, %v2172_v8  ;;  %v886_v9 = vrot.slane %v1872_v41, %v2172_v8 }
  0xff   : > { %v1023_v10 = vadd.f32 %v1017_v20, %v1850_v53  ;;  %v1024_v28 = vadd.f32 %v1018_v30, %v2173_v2  ;;  %v890_v21 = vrot.slane %v2174_v51, %v2172_v8  ;;  %v894_v11 = vrot.slane %v1883_v15, %v2172_v8  ;;  %v2182_v30 = vld [vmem:[#allocation23_spill] sm:$0xff] }
 0x100   : > { %v898_v12 = vrot.slane %v1889_v40, %v2172_v8  ;;  %v902_v24 = vrot.slane %v1895_v17, %v2172_v8  ;;  %v903_v47 = vmul.f32 %v882_v33, %v877_v50  ;;  %v904_v55 = vmul.f32 %v886_v9, %v877_v50 }
 0x101   : > { %v905_v1 = vmul.f32 %v890_v21, %v877_v50  ;;  %v906_v32 = vmul.f32 %v894_v11, %v877_v50  ;;  %v922_v53 = vrot.slane %v1867_v27, %v2175_v16  ;;  %v926_v52 = vrot.slane %v1872_v41, %v2175_v16  ;;  %v2176_v41 = vld [vmem:[#allocation14_spill] sm:$0xff] }
 0x102   : > { %v907_v19 = vmul.f32 %v898_v12, %v877_v50  ;;  %v908_v36 = vmul.f32 %v902_v24, %v877_v50  ;;  %v930_v43 = vrot.slane %v2174_v51, %v2175_v16  ;;  %v934_v22 = vrot.slane %v1883_v15, %v2175_v16 }
 0x103   : > { %v938_v3 = vrot.slane %v1889_v40, %v2175_v16  ;;  %v942_v31 = vrot.slane %v1895_v17, %v2175_v16  ;;  %v943_v63 = vmul.f32 %v922_v53, %v917_v57  ;;  %v944_v27 = vmul.f32 %v926_v52, %v917_v57  ;;  %v2181_v40 = vld [vmem:[#allocation19_spill] sm:$0xff] }
 0x104   : > { %v945_v42 = vmul.f32 %v930_v43, %v917_v57  ;;  %v946_v60 = vmul.f32 %v934_v22, %v917_v57  ;;  %v1045_v25 = vmul.f32 %v1043_v23, %v2176_v41  ;;  %v1046_v50 = vmul.f32 %v1043_v23, %v2177_v13 }
 0x105   : > { %v947_v45 = vmul.f32 %v938_v3, %v917_v57  ;;  %v948_v56 = vmul.f32 %v942_v31, %v917_v57  ;;  %v1047_v46 = vmul.f32 %v1043_v23, %v2178_v38  ;;  %v1048_v15 = vmul.f32 %v1043_v23, %v2179_v6  ;;  %v2183_v57 = vld [vmem:[#allocation24_spill] sm:$0xff] }
 0x106   : > { %v1049_v61 = vmul.f32 %v1043_v23, %v2180_v5  ;;  %v1050_v54 = vmul.f32 %v1043_v23, %v2181_v40  ;;  %v909_v58 = vadd.f32 %v903_v47, %v869_v59  ;;  %v910_v17 = vadd.f32 %v904_v55, %v870_v62  ;;  %v2184_v59 = vld [vmem:[#allocation25_spill] sm:$0xff]  ;;  %v2186_v55 = vld [vmem:[#allocation27_spill] sm:$0xff]  ;;  %v1061_v23 = vpop.permute.xlu1 %1060 }
 0x107   : > { %v911_v14 = vadd.f32 %v905_v1, %v871_v0  ;;  %v912_v39 = vadd.f32 %v906_v32, %v872_v29  ;;  %v913_v48 = vadd.f32 %v907_v19, %v873_v37  ;;  %v914_v49 = vadd.f32 %v908_v36, %v874_v44  ;;  %v2185_v0 = vld [vmem:[#allocation26_spill] sm:$0xff]  ;;  %v2187_v32 = vld [vmem:[#allocation28_spill] sm:$0xff] }
 0x108   : > { %v949_v20 = vadd.f32 %v943_v63, %v909_v58  ;;  %v950_v26 = vadd.f32 %v944_v27, %v910_v17  ;;  %v1035_v8 = vadd.f32 %v2182_v30, %v1019_v18  ;;  %v1036_v33 = vadd.f32 %v2183_v57, %v1020_v34 }
 0x109   : > { %v951_v9 = vadd.f32 %v945_v42, %v911_v14  ;;  %v952_v2 = vadd.f32 %v946_v60, %v912_v39  ;;  %v953_v51 = vadd.f32 %v947_v45, %v913_v48  ;;  %v954_v21 = vadd.f32 %v948_v56, %v914_v49 }
 0x10a   : > { %v2021_v11 = vadd.f32 %v959_v4, %v949_v20  ;;  %v2023_v12 = vadd.f32 %v959_v4, %v950_v26  ;;  %v1037_v62 = vadd.f32 %v2184_v59, %v1021_v35  ;;  %v1038_v29 = vadd.f32 %v2185_v0, %v1022_v7 }
 0x10b   : > { %v2027_v37 = vadd.f32 %v959_v4, %v951_v9  ;;  %v2029_v44 = vadd.f32 %v959_v4, %v952_v2  ;;  %v2031_v24 = vadd.f32 %v959_v4, %v953_v51  ;;  %v2033_v18 = vadd.f32 %v959_v4, %v954_v21 }
 0x10c   : > { %v967_v34 = vmul.f32 0.5, %v2021_v11  ;;  %v968_v47 = vmul.f32 0.5, %v2023_v12  ;;  %v1039_v1 = vadd.f32 %v2186_v55, %v1023_v10  ;;  %v1040_v16 = vadd.f32 %v2187_v32, %v1024_v28 }
 0x10d   : > { %v969_v35 = vmul.f32 0.5, %v2027_v37  ;;  %v970_v7 = vmul.f32 0.5, %v2029_v44  ;;  %v971_v53 = vmul.f32 0.5, %v2031_v24  ;;  %v972_v52 = vmul.f32 0.5, %v2033_v18 }
 0x10e   : > { %1337 = vtanh.f32 %v967_v34  ;;  %v1051_v19 = vadd.f32 %v1045_v25, %v1035_v8  ;;  %v1052_v36 = vadd.f32 %v1046_v50, %v1036_v33  ;;  %v1053_v43 = vadd.f32 %v1047_v46, %v1037_v62 }
 0x10f   : > { %1339 = vtanh.f32 %v968_v47  ;;  %v1054_v22 = vadd.f32 %v1048_v15, %v1038_v29  ;;  %v1055_v3 = vadd.f32 %v1049_v61, %v1039_v1  ;;  %v1056_v31 = vadd.f32 %v1050_v54, %v1040_v16 }
 0x110   : > { %1341 = vtanh.f32 %v969_v35  ;;  %v1063_v10 = vadd.f32 %v1061_v23, %v1051_v19  ;;  %v1064_v28 = vadd.f32 %v1061_v23, %v1052_v36  ;;  %v1065_v63 = vadd.f32 %v1061_v23, %v1053_v43 }
 0x111   : > { %1343 = vtanh.f32 %v970_v7  ;;  %v1066_v27 = vadd.f32 %v1061_v23, %v1054_v22  ;;  %v2043_v42 = vadd.f32 %v1061_v23, %v1055_v3  ;;  %v2045_v60 = vadd.f32 %v1061_v23, %v1056_v31 }
 0x112   : > { %1345 = vtanh.f32 %v971_v53  ;;  %v1069_v41 = vmul.f32 0.5, %v1063_v10  ;;  %v1070_v13 = vmul.f32 0.5, %v1064_v28  ;;  %v1071_v25 = vmul.f32 0.5, %v1065_v63 }
 0x113   : > { %1347 = vtanh.f32 %v972_v52  ;;  %v1072_v50 = vmul.f32 0.5, %v1066_v27  ;;  %v1073_v45 = vmul.f32 0.5, %v2043_v42  ;;  %v1074_v56 = vmul.f32 0.5, %v2045_v60 }
 0x114   : > { %1349 = vtanh.f32 %v1069_v41 }
 0x115   : > { %1351 = vtanh.f32 %v1070_v13 }
 0x116   : > { %1353 = vtanh.f32 %v1071_v25 }
 0x117   : > { %1355 = vtanh.f32 %v1072_v50 }
 0x118   : > { %v1338_v38 = vpop.eup %1337  ;;  %1357 = vtanh.f32 %v1073_v45 }
 0x119   : > { %v1340_v46 = vpop.eup %1339  ;;  %v979_v6 = vadd.f32 1.0, %v1338_v38  ;;  %1359 = vtanh.f32 %v1074_v56 }
 0x11a   : > { %v1342_v15 = vpop.eup %1341  ;;  %v980_v5 = vadd.f32 1.0, %v1340_v46 }
 0x11b   : > { %v1344_v61 = vpop.eup %1343  ;;  %v981_v58 = vadd.f32 1.0, %v1342_v15  ;;  %v985_v17 = vmul.f32 0.5, %v979_v6 }
 0x11c   : > { %v1346_v40 = vpop.eup %1345  ;;  %v982_v14 = vadd.f32 1.0, %v1344_v61  ;;  %v986_v39 = vmul.f32 0.5, %v980_v5 }
 0x11d   : > { %v1348_v54 = vpop.eup %1347  ;;  %v983_v49 = vadd.f32 1.0, %v1346_v40  ;;  %v987_v33 = vmul.f32 0.5, %v981_v58  ;;  %v991_v9 = vmul.f32 %v985_v17, %v2021_v11 }
 0x11e   : > { %v1350_v4 = vpop.eup %1349  ;;  %v984_v30 = vadd.f32 1.0, %v1348_v54  ;;  %v988_v59 = vmul.f32 0.5, %v982_v14  ;;  %v992_v62 = vmul.f32 %v986_v39, %v2023_v12 }
 0x11f   : > { %v1352_v48 = vpop.eup %1351  ;;  %v1081_v20 = vadd.f32 1.0, %v1350_v4  ;;  %v989_v47 = vmul.f32 0.5, %v983_v49  ;;  %v993_v52 = vmul.f32 %v987_v33, %v2027_v37 }
 0x120   : > { %v1354_v26 = vpop.eup %1353  ;;  %v1082_v8 = vadd.f32 1.0, %v1352_v48  ;;  %v990_v16 = vmul.f32 0.5, %v984_v30  ;;  %v994_v36 = vmul.f32 %v988_v59, %v2029_v44  ;;  %v2188_v44 = vld [vmem:[#allocation10_spill] sm:$0xff] }
 0x121   : > { %v1356_v57 = vpop.eup %1355  ;;  %v1083_v2 = vadd.f32 1.0, %v1354_v26  ;;  %v1087_v51 = vmul.f32 0.5, %v1081_v20  ;;  %v995_v3 = vmul.f32 %v989_v47, %v2031_v24 }
 0x122   : > { %v1358_v21 = vpop.eup %1357  ;;  %v1084_v0 = vadd.f32 1.0, %v1356_v57  ;;  %v1088_v29 = vmul.f32 0.5, %v1082_v8  ;;  %v996_v41 = vmul.f32 %v990_v16, %v2033_v18  ;;  %v2190_v18 = vld [vmem:[#allocation12_spill] sm:$0xff] }
 0x123   : > { %v1360_v34 = vpop.eup %1359  ;;  %v1085_v55 = vadd.f32 1.0, %v1358_v21  ;;  %v1089_v1 = vmul.f32 0.5, %v1083_v2  ;;  %v1093_v32 = vmul.f32 %v1087_v51, %v1063_v10 }
 0x124   : > { %v1086_v35 = vadd.f32 1.0, %v1360_v34  ;;  %v1090_v7 = vmul.f32 0.5, %v1084_v0  ;;  %v1094_v53 = vmul.f32 %v1088_v29, %v1064_v28 }
 0x125   : > { %v1091_v11 = vmul.f32 0.5, %v1085_v55  ;;  %v1095_v23 = vmul.f32 %v1089_v1, %v1065_v63  ;;  %v1099_v19 = vmul.f32 %v1093_v32, %v991_v9 }
 0x126   : > { %v1092_v12 = vmul.f32 0.5, %v1086_v35  ;;  %v1096_v43 = vmul.f32 %v1090_v7, %v1066_v27  ;;  %v1100_v22 = vmul.f32 %v1094_v53, %v992_v62  ;;  %v2189_v27 = vld [vmem:[#allocation11_spill] sm:$0xff] }
 0x127   : > { %v1097_v31 = vmul.f32 %v1091_v11, %v2043_v42  ;;  %v1101_v10 = vmul.f32 %v1095_v23, %v993_v52 }
 0x128   : > { %v1098_v28 = vmul.f32 %v1092_v12, %v2045_v60  ;;  %v1102_v37 = vmul.f32 %v1096_v43, %v994_v36  ;;  %v1111_v13 = vcombine.low %v1099_v19, %v1100_v22 }
 0x129   : > { %v1103_v63 = vmul.f32 %v1097_v31, %v995_v3 }
 0x12a   : > { %v1104_v25 = vmul.f32 %v1098_v28, %v996_v41  ;;  %v1112_v50 = vcombine.low %v1101_v10, %v1102_v37  ;;  %v1117_v45 = vadd.f32 %v1111_v13, %v2188_v44 }
 0x12c   : > { %v1113_v24 = vcombine.low %v1103_v63, %v1104_v25  ;;  %v1118_v42 = vadd.f32 %v1112_v50, %v2189_v27  ;;  %1120 = vst [vmem:[%s312_s8] sm:$0xff] %v1117_v45 }
 0x12e   : > { %v1119_v56 = vadd.f32 %v1113_v24, %v2190_v18  ;;  %1121 = vst [vmem:[%s312_s8 + $0x8] sm:$0xff] %v1118_v42 }
 0x130   : > { %1122 = vst [vmem:[%s312_s8 + $0x10] sm:$0xff] %v1119_v56 }
 0x131   : > { %1404 = shalt.err (!%p1401_p4)
}
 0x132   : > { %s1405_s11 = scalar_lea.hbm %s2066_s22, 384  ;;  %s1409_s23 = scalar_lea.hbm %s2122_s7, 768 }
 0x133   : > { %p1406_p6 = scmp.ne.s32.totalorder %s2066_s22, %s1405_s11  ;;  %p1410_p12 = scmp.lt.u32.totalorder %s2066_s22, %s2122_s7 }
 0x134   : > { %p1411_p1 = scmp.lt.u32.totalorder %s1409_s23, %s1405_s11  ;;  %p1413_p8 = scmp.lt.u32.totalorder %s1405_s11, %s2066_s22 }
 0x135   : > { %p1407_p7 = pnand %p1406_p6, %p2191_p9 }
 0x136   : > { %p1412_p3 = por %p1411_p1, %p1410_p12 }
 0x137   : > { %p1408_p10 = pneg %p1407_p7 }
 0x138   : > { %p1414_p11 = por %p1413_p8, %p1412_p3 }
 0x13a   : > { %p1415_p0 = pnand %p1414_p11, %p1408_p10 }
 0x13c   : > { %1418 = shalt.err (!%p1415_p0)
}
 0x13d   : > { %1239 = dma.vmem_to_hbm [thread:$0]  (%p2191_p9), %s2068_s10, 384, %s2066_s22, %s1124_s27  }
 0x13e PF: > { %s1152_s21 = sand.u32 1, %s1453_s24   ;;  %p2192_p5 = scmp.ne.s32.totalorder %s2146_s16, 0 }
 0x13f   : > { %p2193_p13 = scmp.ge.s32.totalorder %s1473_s29, 2  ;;  %s1153_s13 = scalar_lea.sflag [#allocation4], %s1152_s21 }
 0x141   : > { %p1246_p2 = pnand %p2193_p13, %p2192_p5 }
 0x143   : > { %1448 = dma.done.wait (!%p1246_p2), %s1153_s13, 384  }
 0x144   : > { %1450 = vsyncadd (!%p1246_p2), %s1153_s13, 4294966912  ;;  %s23_s29 = sadd.s32 1, %s1473_s29   ;;  %s2194_s14 = sld [smem:[#allocation8_spill]] }
 0x145   : > { %p20_p4 = scmp.ge.s32.totalorder %s23_s29, 4   ;;  %s2195_s24 = smov %s1457_s25 }
 0x146   : > { %s2196_s25 = smov %s1461_s26  ;;  %s2197_s26 = smov %s1581_s15 }
 0x147   : > { %s2198_s27 = smov %s1469_s28  ;;  %22 = sbr.rel (!%p20_p4) target bundleno = 6 (0x6), region = 93 }
 0x14a   : > { %s2199_s28 = smov %s2194_s14 }
 0x14e   :  { %1158 = vsyncpa [#allocation3], 1 }
 0x14f   :  { %1160 = vsyncpa [#allocation3 + $0x1], 1 }
 0x150   :  { %1161 = vsyncpa [#allocation4], 1 }
 0x151   :  { %1163 = vsyncpa [#allocation4 + $0x1], 1 }

</bundles_post_ra>
